<compile_context>
chip_gen: v6e
topology: v6e:2x2x1
jax: 0.10.0
libtpu: 0.0.40
codegen_flags: <defaults>
</compile_context>

<pallas_src>
import math

import jax
import jax.numpy as jnp
from jax import lax
from jax.experimental import pallas as pl
from jax.experimental.pallas import tpu as pltpu


_GAMMA_CONC = 0.1
_GAMMA_RATE = 0.3

# Preferred tile sizes for the data-likelihood kernel (used only when the
# corresponding dim exceeds them; otherwise the full dim is a single block).
_TD_PREF = 256     # multiple of 8  (sublane axis of counts/mask tiles)
_TB_PREF = 512     # multiple of 128 (lane axis)

_VMEM_LIMIT = 32 * 1024 * 1024   # safe on v5e/v6e/v7x; tiles stay well below


# ---------------------------------------------------------------------------
# Kernel 1: data log-likelihood
#   grid = (nD, nB, S); S is the reduction (innermost) axis.
#   For one (D-tile, B-tile) pair and sample s:
#     rate[d, b] = sum_l v[s, d, l] * u_sel[s, l, b]            (MXU)
#     ll[d, b]   = cm[d,b]*log(rate) - mask[d,b]*rate
#   (cm = counts * (1-holdout) transposed; lgamma term folded in the wrapper.)
#   Partial sum accumulated in VMEM scratch, written once at s == S-1.
# ---------------------------------------------------------------------------
def _data_ll_kernel(v_ref, u_ref, cm_ref, mask_ref, out_ref, acc_ref):
    s = pl.program_id(2)

    @pl.when(s == 0)
    def _():
        acc_ref[...] = jnp.zeros_like(acc_ref)

    rate = jnp.dot(v_ref[0], u_ref[0], preferred_element_type=jnp.float32)
    rate = jnp.maximum(rate, 1e-30)                 # guard log() underflow
    ll = cm_ref[...] * jnp.log(rate) - mask_ref[...] * rate
    acc_ref[...] += jnp.sum(ll).reshape(1, 1)

    @pl.when(s == pl.num_programs(2) - 1)
    def _():
        out_ref[0, 0] = acc_ref[...]


# ---------------------------------------------------------------------------
# Kernel 2: sample-dependent part of log-prior (Gamma(0.1,0.3)) and entropy
# (-LogNormal log_prob).  Inputs are logx (= loc + scale*eps, i.e. log of the
# samples) plus the sample-invariant loc and 1/(2*scale^2).  All constant
# terms (Gamma normalizer, log(scale)+0.5*log(2pi)) are added in the wrapper.
# Accumulates sums over S in scratch; final write + /S happen outside the loop.
# ---------------------------------------------------------------------------
def _prior_entropy_kernel(logx_ref, loc_ref, inv2var_ref, lp_ref, ent_ref,
                          lp_acc, ent_acc):
    s = pl.program_id(0)

    @pl.when(s == 0)
    def _():
        lp_acc[...] = jnp.zeros_like(lp_acc)
        ent_acc[...] = jnp.zeros_like(ent_acc)

    logx = logx_ref[0]                              # [R, C]
    x = jnp.exp(logx)
    # Gamma(conc, rate) log-prob, sample-dependent part:
    lp_acc[...] += jnp.sum((_GAMMA_CONC - 1.0) * logx - _GAMMA_RATE * x).reshape(1, 1)
    # -LogNormal log-prob, sample-dependent part:
    d = logx - loc_ref[...]
    ent_acc[...] += jnp.sum(logx + d * d * inv2var_ref[...]).reshape(1, 1)

    @pl.when(s == pl.num_programs(0) - 1)
    def _():
        lp_ref[...] = lp_acc[...]
        ent_ref[...] = ent_acc[...]


# ---------------------------------------------------------------------------
# Wrappers
# ---------------------------------------------------------------------------
def _xavier_uniform(key, shape):
    fan_out, fan_in = shape
    bound = math.sqrt(6.0 / (fan_in + fan_out))
    return jax.random.uniform(key, shape, jnp.float32, -bound, bound)


def init_pmf_params(key, num_datapoints, data_dim, latent_dim):
    k1, k2, k3, k4 = jax.random.split(key, 4)
    loc_v = _xavier_uniform(k1, (data_dim, latent_dim))
    logscale_v = _xavier_uniform(k2, (data_dim, latent_dim))
    loc_u = _xavier_uniform(k3, (latent_dim, num_datapoints))
    logscale_u = _xavier_uniform(k4, (latent_dim, num_datapoints))
    return loc_v, logscale_v, loc_u, logscale_u


def _pad_axis(x, axis, new_size, value):
    pad = new_size - x.shape[axis]
    if pad == 0:
        return x
    widths = [(0, 0)] * x.ndim
    widths[axis] = (0, pad)
    return jnp.pad(x, widths, constant_values=value)


def _run_data_ll(v_p, u_p, cm_t, maskc_t, tD, tB):
    """Returns sum over samples/tiles of cm*log(rate) - mask*rate."""
    S, Dp, L = v_p.shape
    Bp = u_p.shape[2]
    nD, nB = Dp // tD, Bp // tB
    out = pl.pallas_call(
        _data_ll_kernel,
        out_shape=jax.ShapeDtypeStruct((nD, nB, 1, 1), jnp.float32),
        grid_spec=pltpu.PrefetchScalarGridSpec(
            num_scalar_prefetch=0,
            grid=(nD, nB, S),
            in_specs=[
                pl.BlockSpec((1, tD, L), lambda di, bi, s: (s, di, 0)),
                pl.BlockSpec((1, L, tB), lambda di, bi, s: (s, 0, bi)),
                pl.BlockSpec((tD, tB), lambda di, bi, s: (di, bi)),
                pl.BlockSpec((tD, tB), lambda di, bi, s: (di, bi)),
            ],
            out_specs=pl.BlockSpec((1, 1, 1, 1), lambda di, bi, s: (di, bi, 0, 0)),
            scratch_shapes=[pltpu.VMEM((1, 1), jnp.float32)],
        ),
        compiler_params=pltpu.CompilerParams(
            dimension_semantics=("parallel", "parallel", "arbitrary"),
            vmem_limit_bytes=_VMEM_LIMIT,
        ),
    )(v_p, u_p, cm_t, maskc_t)
    return jnp.sum(out)


def _run_prior_entropy(logx, loc, inv2var):
    """Returns (sum over S of variable log-prior part,
                sum over S of variable entropy part)."""
    S, R, C = logx.shape
    lp, ent = pl.pallas_call(
        _prior_entropy_kernel,
        out_shape=(jax.ShapeDtypeStruct((1, 1), jnp.float32),
                   jax.ShapeDtypeStruct((1, 1), jnp.float32)),
        grid_spec=pltpu.PrefetchScalarGridSpec(
            num_scalar_prefetch=0,
            grid=(S,),
            in_specs=[
                pl.BlockSpec((1, R, C), lambda s: (s, 0, 0)),
                pl.BlockSpec((R, C), lambda s: (0, 0)),
                pl.BlockSpec((R, C), lambda s: (0, 0)),
            ],
            out_specs=(pl.BlockSpec((1, 1), lambda s: (0, 0)),
                       pl.BlockSpec((1, 1), lambda s: (0, 0))),
            scratch_shapes=[pltpu.VMEM((1, 1), jnp.float32),
                            pltpu.VMEM((1, 1), jnp.float32)],
        ),
        compiler_params=pltpu.CompilerParams(
            dimension_semantics=("arbitrary",),
            vmem_limit_bytes=_VMEM_LIMIT,
        ),
    )(logx, loc, inv2var)
    return lp[0, 0], ent[0, 0]


def pmf_forward(params, datapoints_indices, data, holdout_mask, key,
                num_samples, num_datapoints):
    """Equivalent of PMF.forward (summary-writer logging omitted)."""
    loc_v, logscale_v, loc_u, logscale_u = params
    D, L = loc_v.shape
    N = loc_u.shape[1]
    B = data.shape[0]
    S = num_samples

    # --- variational scales (stable softplus, clamped like torch) ---
    scale_v = jnp.maximum(jax.nn.softplus(logscale_v), 1e-5)
    scale_u = jnp.maximum(jax.nn.softplus(logscale_u), 1e-5)

    # --- reparameterized LogNormal sampling (glue, plain JAX) ---
    k_v, k_u = jax.random.split(key)
    eps_v = jax.random.normal(k_v, (S, D, L), dtype=jnp.float32)
    eps_u = jax.random.normal(k_u, (S, L, N), dtype=jnp.float32)
    logx_v = loc_v[None] + scale_v[None] * eps_v      # log of v samples
    logx_u = loc_u[None] + scale_u[None] * eps_u      # log of u samples
    v_samples = jnp.exp(logx_v)                       # [S, D, L]
    u_samples = jnp.exp(logx_u)                       # [S, L, N]

    # --- data log-likelihood (Pallas, D/B tiled, S reduced in-kernel) ---
    u_sel = u_samples[:, :, datapoints_indices]       # [S, L, B]
    counts = jnp.asarray(data, jnp.float32)           # [B, D]
    maskc = 1.0 - jnp.asarray(holdout_mask, jnp.float32)
    cm_t = (counts * maskc).T                         # [D, B]
    maskc_t = maskc.T                                 # [D, B]
    # lgamma(counts+1) is sample-invariant: fold it once, outside the kernel.
    lgam_masked = jnp.sum(maskc * lax.lgamma(counts + 1.0))

    tD = D if D <= _TD_PREF else _TD_PREF
    tB = B if B <= _TB_PREF else _TB_PREF
    Dp = pl.cdiv(D, tD) * tD
    Bp = pl.cdiv(B, tB) * tB
    v_in = _pad_axis(v_samples, 1, Dp, 1.0)           # positive pad -> rate > 0
    u_in = _pad_axis(u_sel, 2, Bp, 1.0)
    cm_in = _pad_axis(_pad_axis(cm_t, 0, Dp, 0.0), 1, Bp, 0.0)
    m_in = _pad_axis(_pad_axis(maskc_t, 0, Dp, 0.0), 1, Bp, 0.0)
    if L >= 128:
        # Large contraction dim: bf16 operands ~3x MXU throughput (f32 acc).
        v_in = v_in.astype(jnp.bfloat16)
        u_in = u_in.astype(jnp.bfloat16)

    data_sum = _run_data_ll(v_in, u_in, cm_in, m_in, tD, tB) - S * lgam_masked
    # torch: sum over batch axis, scale by N/B, then mean over [S, D]
    data_log_likelihood = data_sum * (num_datapoints / B) / (S * D)

    # --- log prior + entropy (Pallas; constants hoisted here) ---
    inv2var_v = 1.0 / (2.0 * scale_v * scale_v)
    inv2var_u = 1.0 / (2.0 * scale_u * scale_u)
    lp_v, ent_v = _run_prior_entropy(logx_v, loc_v, inv2var_v)
    lp_u, ent_u = _run_prior_entropy(logx_u, loc_u, inv2var_u)

    numel = loc_v.size + loc_u.size
    gamma_const = _GAMMA_CONC * math.log(_GAMMA_RATE) - math.lgamma(_GAMMA_CONC)
    log_prior = (lp_v + lp_u) / S + numel * gamma_const
    ent_const = (jnp.sum(jnp.log(scale_v)) + jnp.sum(jnp.log(scale_u))
                 + 0.5 * math.log(2.0 * math.pi) * numel)
    entropy = (ent_v + ent_u) / S + ent_const

    # TODO(synk): SummaryWriter tensorboard logging has no Pallas equivalent.
    elbo = data_log_likelihood + log_prior + entropy
    return elbo


if __name__ == "__main__":
    num_datapoints = 8
    data_dim = 16
    latent_dim = 4
    num_samples = 2
    batch_size = 8

    root = jax.random.PRNGKey(0)
    k_params, k_data, k_mask, k_sample = jax.random.split(root, 4)

    params = init_pmf_params(k_params, num_datapoints, data_dim, latent_dim)

    datapoints_indices = jnp.arange(batch_size, dtype=jnp.int32)
    data = jax.random.randint(k_data, (batch_size, data_dim), 0, 5).astype(jnp.float32)
    holdout_mask = jax.random.bernoulli(k_mask, 0.2, (batch_size, data_dim)).astype(jnp.float32)

    elbo = pmf_forward(params, datapoints_indices, data, holdout_mask,
                       k_sample, num_samples, num_datapoints)
    elbo = jax.block_until_ready(elbo)
    assert bool(jnp.isfinite(elbo)), "ELBO is not finite"
    print("KERNEL_OK")
</pallas_src>

<mosaic_0001>
module attributes {stable_mosaic.version = 11 : i64} {
  func.func @_data_ll_kernel(%arg0: i32, %arg1: i32, %arg2: i32, %arg3: memref<1x16x4xf32, #tpu.memory_space<vmem>>, %arg4: memref<1x4x8xf32, #tpu.memory_space<vmem>>, %arg5: memref<16x8xf32, #tpu.memory_space<vmem>>, %arg6: memref<16x8xf32, #tpu.memory_space<vmem>>, %arg7: memref<1x1x1x1xf32, #tpu.memory_space<vmem>>, %arg8: memref<1x1xf32, #tpu.memory_space<vmem>>) attributes {dimension_semantics = [#tpu.dimension_semantics<parallel>, #tpu.dimension_semantics<parallel>, #tpu.dimension_semantics<arbitrary>], iteration_bounds = array<i64: 1, 1, 2>, scalar_prefetch = 0 : i64, scratch_operands = 1 : i64, tpu.core_type = #tpu.core_type<tc>, window_params = [{transform_indices = @transform_0, window_bounds = array<i64: 1, 16, 4>}, {transform_indices = @transform_1, window_bounds = array<i64: 1, 4, 8>}, {transform_indices = @transform_2, window_bounds = array<i64: 16, 8>}, {transform_indices = @transform_3, window_bounds = array<i64: 16, 8>}, {transform_indices = @transform_4, window_bounds = array<i64: 1, 1, 1, 1>}]} {
    %c0_i32 = arith.constant 0 : i32
    %0 = arith.cmpi eq, %arg2, %c0_i32 : i32
    %1 = arith.extui %0 : i1 to i32
    %c0_i32_0 = arith.constant 0 : i32
    %2 = arith.cmpi ne, %1, %c0_i32_0 : i32
    scf.if %2 {
      %cst_17 = arith.constant 0.000000e+00 : f32
      %27 = vector.broadcast %cst_17 : f32 to vector<1x1xf32>
      %c0_18 = arith.constant 0 : index
      %c0_19 = arith.constant 0 : index
      %28 = vector.load %arg8[%c0_18, %c0_19] : memref<1x1xf32, #tpu.memory_space<vmem>>, vector<1x1xf32>
      tpu.vector_store %arg8[%c0_18, %c0_19], %27 {strides = array<i32>} : memref<1x1xf32, #tpu.memory_space<vmem>>, vector<1x1xf32>,
    } else {
    }
    %c0 = arith.constant 0 : index
    %c0_1 = arith.constant 0 : index
    %c0_2 = arith.constant 0 : index
    %3 = vector.load %arg3[%c0, %c0_1, %c0_2] : memref<1x16x4xf32, #tpu.memory_space<vmem>>, vector<1x16x4xf32>
    %4 = vector.shape_cast %3 : vector<1x16x4xf32> to vector<16x4xf32>
    %c0_3 = arith.constant 0 : index
    %c0_4 = arith.constant 0 : index
    %c0_5 = arith.constant 0 : index
    %5 = vector.load %arg4[%c0_3, %c0_4, %c0_5] : memref<1x4x8xf32, #tpu.memory_space<vmem>>, vector<1x4x8xf32>
    %6 = vector.shape_cast %5 : vector<1x4x8xf32> to vector<4x8xf32>
    %cst = arith.constant dense<0.000000e+00> : vector<16x8xf32>
    %7 = tpu.matmul %4, %6, %cst {dimension_numbers = #tpu.dot_dimension_numbers<[1], [0], [0], [1], [0, 0, 1, 1], [], []>} : vector<16x4xf32>, vector<4x8xf32>, vector<16x8xf32> -> vector<16x8xf32>
    %cst_6 = arith.constant 1.000000e-30 : f32
    %8 = vector.broadcast %cst_6 : f32 to vector<16x8xf32>
    %9 = arith.maximumf %7, %8 : vector<16x8xf32>
    %c0_7 = arith.constant 0 : index
    %c0_8 = arith.constant 0 : index
    %10 = vector.load %arg5[%c0_7, %c0_8] : memref<16x8xf32, #tpu.memory_space<vmem>>, vector<16x8xf32>
    %11 = math.log %9 : vector<16x8xf32>
    %12 = arith.mulf %10, %11 : vector<16x8xf32>
    %c0_9 = arith.constant 0 : index
    %c0_10 = arith.constant 0 : index
    %13 = vector.load %arg6[%c0_9, %c0_10] : memref<16x8xf32, #tpu.memory_space<vmem>>, vector<16x8xf32>
    %14 = arith.mulf %13, %9 : vector<16x8xf32>
    %15 = arith.subf %12, %14 : vector<16x8xf32>
    %c0_11 = arith.constant 0 : index
    %c0_12 = arith.constant 0 : index
    %16 = vector.load %arg8[%c0_11, %c0_12] : memref<1x1xf32, #tpu.memory_space<vmem>>, vector<1x1xf32>
    %17 = vector.shape_cast %15 : vector<16x8xf32> to vector<1x16x8xf32>
    %cst_13 = arith.constant dense<0.000000e+00> : vector<1xf32>
    %18 = vector.multi_reduction <add>, %17, %cst_13 [1, 2] : vector<1x16x8xf32> to vector<1xf32>
    %19 = vector.shape_cast %18 : vector<1xf32> to vector<1x1x1xf32>
    %20 = vector.extract %19[0, 0, 0] : f32 from vector<1x1x1xf32>
    %21 = vector.broadcast %20 : f32 to vector<1x1xf32>
    %22 = arith.addf %16, %21 : vector<1x1xf32>
    %c0_14 = arith.constant 0 : index
    %c0_15 = arith.constant 0 : index
    %23 = vector.load %arg8[%c0_14, %c0_15] : memref<1x1xf32, #tpu.memory_space<vmem>>, vector<1x1xf32>
    tpu.vector_store %arg8[%c0_14, %c0_15], %22 {strides = array<i32>} : memref<1x1xf32, #tpu.memory_space<vmem>>, vector<1x1xf32>,
    %c1_i32 = arith.constant 1 : i32
    %24 = arith.cmpi eq, %arg2, %c1_i32 : i32
    %25 = arith.extui %24 : i1 to i32
    %c0_i32_16 = arith.constant 0 : i32
    %26 = arith.cmpi ne, %25, %c0_i32_16 : i32
    scf.if %26 {
      %c0_17 = arith.constant 0 : index
      %c0_18 = arith.constant 0 : index
      %27 = vector.load %arg8[%c0_17, %c0_18] : memref<1x1xf32, #tpu.memory_space<vmem>>, vector<1x1xf32>
      %c0_19 = arith.constant 0 : index
      %c0_20 = arith.constant 0 : index
      %c0_21 = arith.constant 0 : index
      %c0_22 = arith.constant 0 : index
      %28 = vector.load %arg7[%c0_19, %c0_20, %c0_21, %c0_22] : memref<1x1x1x1xf32, #tpu.memory_space<vmem>>, vector<1x1x1x1xf32>
      %29 = vector.shape_cast %28 : vector<1x1x1x1xf32> to vector<1x1xf32>
      %30 = vector.shape_cast %27 : vector<1x1xf32> to vector<1x1x1x1xf32>
      tpu.vector_store %arg7[%c0_19, %c0_20, %c0_21, %c0_22], %30 {strides = array<i32>} : memref<1x1x1x1xf32, #tpu.memory_space<vmem>>, vector<1x1x1x1xf32>,
    } else {
    }
    return
  }
  func.func @transform_0(%arg0: i32, %arg1: i32, %arg2: i32) -> (i32, i32, i32) {
    %c0_i32 = arith.constant 0 : i32
    %c0_i32_0 = arith.constant 0 : i32
    return %arg2, %arg0, %c0_i32 : i32, i32, i32
  }
  func.func @transform_1(%arg0: i32, %arg1: i32, %arg2: i32) -> (i32, i32, i32) {
    %c0_i32 = arith.constant 0 : i32
    %c0_i32_0 = arith.constant 0 : i32
    return %arg2, %c0_i32, %arg1 : i32, i32, i32
  }
  func.func @transform_2(%arg0: i32, %arg1: i32, %arg2: i32) -> (i32, i32) {
    %c0_i32 = arith.constant 0 : i32
    return %arg0, %arg1 : i32, i32
  }
  func.func @transform_3(%arg0: i32, %arg1: i32, %arg2: i32) -> (i32, i32) {
    %c0_i32 = arith.constant 0 : i32
    return %arg0, %arg1 : i32, i32
  }
  func.func @transform_4(%arg0: i32, %arg1: i32, %arg2: i32) -> (i32, i32, i32, i32) {
    %c0_i32 = arith.constant 0 : i32
    %c0_i32_0 = arith.constant 0 : i32
    %c0_i32_1 = arith.constant 0 : i32
    return %arg0, %arg1, %c0_i32, %c0_i32_0 : i32, i32, i32, i32
  }
}

</mosaic_0001>

<bundles_post_ra>
// kernel: tpu_custom_call.1
= control target key start
LH: loop header
LB: loop body
LE: loop exit
PB: predicated region body
PF: predicated region fallthrough
CT: control target
= control target key end

     0   :  { %9 = vsyncpa [#allocation4], 0  ;;  %s720_s15 = smov 0   ;;  %s722_s16 = smov 0   ;;  %s789_s0 = inlined_call_operand.vmem [shape: f32[2,16,4], index: 0, kind: input, shape index: {}]   ;;  %s790_s1 = inlined_call_operand.vmem [shape: f32[2,4,8], index: 1, kind: input, shape index: {}]   ;;  %s791_s2 = inlined_call_operand.vmem [shape: f32[16,8], index: 2, kind: input, shape index: {}]   ;;  %s792_s3 = inlined_call_operand.vmem [shape: f32[16,8], index: 3, kind: input, shape index: {}]   ;;  %s793_s4 = inlined_call_operand.hbm [shape: f32[1,1,1,1], index: 4, kind: output, shape index: {}]  }
   0x1   :  { %s724_s17 = smov 0  }
   0x2 LB: > { %s576_s18 = sadd.s32 4294967295, %s691_s17   ;;  %s27_s19 = sadd.s32 1, %s687_s16  ;;  %s691_s17 = sphi %s724_s17, %s15_s17   ;;  %s687_s16 = sphi %s722_s16, %s796_s16   ;;  %s683_s15 = sphi %s720_s15, %s795_s15  }
   0x3   : > { %p28_p0 = scmp.ge.s32.totalorder %s27_s19, 2  ;;  %p581_p1 = scmp.ge.s32.totalorder %s691_s17, 1 }
   0x4   : > { %p237_p2 = scmp.lt.s32.totalorder %s691_s17, 3 }
   0x5   : > { %s798_s19 = smov (%p28_p0, %s27_s19), 0 }
   0x6   : > { %p238_p3 = pnand %p581_p1, %p237_p2 }
   0x7   : > { %p286_p4 = scmp.lt.s32.totalorder (!%p238_p3), %s683_s15, 1  ;;  %p585_p5 = scmp.ne.s32.totalorder (!%p238_p3), %s683_s15, 0 }
   0x8   : > { %241 = sbr.rel (%p238_p3) target bundleno = 471 (0x1d7), region = 36 }
   0xd   : > { %s287_s20 = scalar_select %p286_p4, %s683_s15, 1 }
   0xe   : > { %323 = sbr.rel (%p585_p5) target bundleno = 21 (0x15), region = 40 }
   0xf   : > { %s594_s21 = sshll.u32 %s287_s20, 4  ;;  %s584_s22 = sshll.u32 %s287_s20, 2 }
  0x10   : > { %s293_s25 = scalar_lea.vmem %s789_s0, %s594_s21  ;;  %s301_s28 = scalar_lea.vmem %s790_s1, %s584_s22 }
  0x13   : > { %vm324_vm0 = vcmask 0   ;;  %v693_v0 = vmov 0.0  }
  0x14   : > { %325 = vst.msk [vmem:[#allocation2] sm:$0x1] %vm324_vm0, %v693_v0 }
  0x15 PF: > { %v328_v1 = vld [vmem:[%s301_s28] sm:$0xf]  ;;  %vm336_vm1 = vcmask 1043456   ;;  %vm329_vm2 = vcmask 31744   ;;  %v327_v3 = vld [vmem:[%s293_s25 + $0x8] sm:$0xff]  ;;  %vm432_vm3 = vcmask 64512  }
  0x16   : > { %v326_v2 = vld [vmem:[%s293_s25] sm:$0xff]  ;;  %598 = vmatprep.subr.msk.mxu0 %vm336_vm1, %v328_v1  ;;  %v426_v9 = vld [vmem:[%s792_s3 + $0x8] sm:$0xff]  ;;  %vm447_vm4 = vcmask 0   ;;  %p589_p6 = scmp.ne.s32.totalorder %s683_s15, 1 }
  0x17   : > { %600 = vmatprep.mubr.msk.f32.mxu0 %vm329_vm2, %v326_v2  ;;  %599 = vmatpush3.msk.msra.mxu0 %vm336_vm1, %v328_v1  ;;  %v418_v10 = vld [vmem:[%s791_s2 + $0x8] sm:$0xff]  ;;  %v425_v13 = vld [vmem:[%s792_s3] sm:$0xff] }
  0x18   : > { %601 = vmatmul.mubr.msk.f32.vlgmr.msra.gmra.mxu0 %vm329_vm2, %v327_v3  ;;  %v417_v14 = vld [vmem:[%s791_s2] sm:$0xff] }
  0x1b   : > { %v431_v32 = vld [vmem:[#allocation2] sm:$0x1] }
  0xd8   : > { %v602_v4 = vpop.f32.mrf.mxu0 }
  0xd9   : > { %v416_v5 = vmax.f32 %v602_v4, 1e-30 }
  0xda   : > { %v406_v6 = vpop.f32.mrf.mxu0 }
  0xdb   : > { %637 = vlog2.f32 %v416_v5  ;;  %v415_v7 = vmax.f32 %v406_v6, 1e-30  ;;  %v428_v15 = vmul.f32 %v426_v9, %v416_v5 }
  0xdd   : > { %639 = vlog2.f32 %v415_v7  ;;  %v427_v18 = vmul.f32 %v425_v13, %v415_v7 }
  0xe8   : > { %v638_v8 = vpop.eup %637 }
  0xe9   : > { %v422_v11 = vmul.f32 0.6931472, %v638_v8 }
  0xea   : > { %v640_v12 = vpop.eup %639 }
  0xeb   : > { %v420_v16 = vmul.f32 0.6931472, %v640_v12  ;;  %v424_v17 = vmul.f32 %v422_v11, %v418_v10 }
  0xed   : > { %v423_v19 = vmul.f32 %v420_v16, %v417_v14  ;;  %v430_v20 = vsub.f32 %v424_v17, %v428_v15 }
  0xef   : > { %v429_v21 = vsub.f32 %v423_v19, %v427_v18  ;;  %v434_v23 = vsel %vm432_vm3, %v430_v20, 0.0 }
  0xf1   : > { %v433_v22 = vsel %vm432_vm3, %v429_v21, 0.0 }
  0xf2   : > { %v435_v24 = vadd.f32 %v434_v23, %v433_v22 }
  0xf4   : > { %436 = vadd.xlane.f32.xlu0 %v435_v24 }
 0x17d   : > { %v437_v25 = vpop.xlane.xlu0 %436 }
 0x17e   : > { %v438_v26 = vrot.slane %v437_v25, 4 }
 0x180   : > { %v439_v27 = vadd.f32 %v438_v26, %v437_v25 }
 0x182   : > { %v440_v28 = vrot.slane %v439_v27, 2 }
 0x184   : > { %v441_v29 = vadd.f32 %v440_v28, %v439_v27 }
 0x186   : > { %v442_v30 = vrot.slane %v441_v29, 1 }
 0x188   : > { %v443_v31 = vadd.f32 %v442_v30, %v441_v29 }
 0x18a   : > { %603 = vpush %v443_v31 }
 0x1bb   : > { %s604_s11 = spop %603  ;;  %452 = sbr.rel (%p589_p6) target bundleno = 456 (0x1c8), region = 44 }
 0x1bc   : > { %v445_v33 = vstv %s604_s11 }
 0x1bd   : > { %v446_v34 = vadd.f32 %v445_v33, %v431_v32 }
 0x1bf   : > { %448 = vst.msk [vmem:[#allocation2] sm:$0x1] %vm447_vm4, %v446_v34 }
 0x1c6   : > { %v453_v35 = vld [vmem:[#allocation2] sm:$0x1] }
 0x1c7   : > { %454 = vst.msk [vmem:[#allocation3] sm:$0x1] %vm447_vm4, %v453_v35 }
 0x1c8 PF: > { %p765_p7 = scmp.eq.s32.totalorder %s576_s18, 1  ;;  %s694_s13 = smov [#allocation3]  }
 0x1c9   : > { %s465_s14 = sshll.u32 %s694_s13, 4  ;;  %s466_s14 = int_to_ptr.vmem [resolvable:$true] %s465_s14 }
 0x1ca   : > { %s641_s20 = scalar_lea.vmem %s466_s14, 16  ;;  %s647_s15 = scalar_lea.vmem %s466_s14, 32 }
 0x1cb   : > { %p642_p8 = scmp.ne.s32.totalorder %s466_s14, %s641_s20  ;;  %p648_p11 = scmp.lt.s32.totalorder %s466_s14, %s466_s14 }
 0x1cc   : > { %p649_p12 = scmp.lt.s32.totalorder %s647_s15, %s641_s20 }
 0x1cd   : > { %p643_p9 = pnand %p642_p8, %p765_p7 }
 0x1ce   : > { %p650_p13 = por %p649_p12, %p648_p11 }
 0x1cf   : > { %p644_p10 = pneg %p643_p9 }
 0x1d1   : > { %p651_p0 = pnand %p650_p13, %p644_p10 }
 0x1d3   : > { %654 = shalt.err (!%p651_p0)
}
 0x1d4   : > { %606 = dma.vmem_to_hbm [thread:$0]  (%p765_p7), %s466_s14, 16, %s793_s4, [#allocation4]  }
 0x1d5   : > { %678 = dma.done.wait (%p765_p7), [#allocation4], 16  }
 0x1d6   : > { %680 = vsyncadd (%p765_p7), [#allocation4], 4294967280 }
 0x1d7 PF: > { %s15_s17 = sadd.s32 1, %s691_s17   ;;  %s795_s15 = smov %s687_s16 }
 0x1d8   : > { %p12_p1 = scmp.ge.s32.totalorder %s15_s17, 4   ;;  %s796_s16 = smov %s798_s19 }
 0x1da   :  { %14 = sbr.rel (!%p12_p1) target bundleno = 2 (0x2), region = 81 }
 0x1df   :  { %478 = vsyncpa [#allocation4], 1 }
 0x1e0   :  { %480 = vsyncpa [#allocation4 + $0x1], 1 }

</bundles_post_ra>
